<compile_context>
chip_gen: v7x
topology: tpu7x:2x2x1
jax: 0.10.0
libtpu: 0.0.40
codegen_flags: <defaults>
</compile_context>

<pallas_src>
import numpy as np
import jax
import jax.numpy as jnp
from jax import lax
from jax.experimental import pallas as pl
from jax.experimental.pallas import tpu as pltpu

LN_EPS = 1e-5  # torch.nn.LayerNorm default eps


def _gelu_exact(h):
    # nn.GELU() default: exact erf-based GELU.  erf is VALU-heavy; only swap to
    # the tanh approximation (EUP slot) if a bundle dump shows VALU saturating
    # AND the tolerance budget allows.
    return 0.5 * h * (1.0 + lax.erf(h * np.float32(1.0 / np.sqrt(2.0))))


def _make_kernel(H, M, WC, conv_dtype):
    """Kernel for one block of M = nb*H rows, WC = W*C lanes."""

    def kernel(x_ref, avg_ref, vec_ref, w1_ref, w2_ref, o_ref):
        avg = avg_ref[...]                            # (WC, WC) f32 group-mean matrix

        # per-row masks (image boundaries along H when nb images are stacked)
        row = lax.broadcasted_iota(jnp.int32, (M, 1), 0)
        top = (row % H) == 0                          # first row of each image
        bot = (row % H) == (H - 1)                    # last row of each image

        def layernorm(h, gamma, beta):
            # Fused LN reductions: one MXU dot gives both mu and E[h^2]
            # (breaks the matmul -> VPU(d*d) -> matmul serial chain).
            hh = jnp.concatenate([h, h * h], axis=0)  # (2M, WC)
            s = jnp.dot(hh, avg, preferred_element_type=jnp.float32)
            mu = s[:M]
            var = s[M:] - mu * mu                     # f32; cancellation well within 1e-4
            return (h - mu) * lax.rsqrt(var + LN_EPS) * gamma + beta

        def conv3x3(h, w_ref, bias):
            # out[y] = in[y-1] @ W0 + in[y] @ W1 + in[y+1] @ W2 + bias.
            # Single 384-lane-wide dot against the column-concatenated ky taps
            # (fills the 256-wide v6e/v7x MXU); operands in conv_dtype,
            # accumulation in f32.
            p = jnp.dot(h.astype(conv_dtype), w_ref[...],
                        preferred_element_type=jnp.float32)     # (M, 3*WC)
            p0 = p[:, 0 * WC:1 * WC]
            p1 = p[:, 1 * WC:2 * WC]
            p2 = p[:, 2 * WC:3 * WC]
            out = p1 + bias
            # row shifts on the sublane axis via XLU roll; mask the H borders.
            out = out + jnp.where(top, 0.0, pltpu.roll(p0, shift=1, axis=0))
            out = out + jnp.where(bot, 0.0, pltpu.roll(p2, shift=M - 1, axis=0))
            return out

        h = _gelu_exact(layernorm(x_ref[0].astype(jnp.float32),
                                  vec_ref[0:1, :], vec_ref[1:2, :]))
        h = conv3x3(h, w1_ref, vec_ref[2:3, :])
        h = _gelu_exact(layernorm(h, vec_ref[3:4, :], vec_ref[4:5, :]))
        h = conv3x3(h, w2_ref, vec_ref[5:6, :])
        # residual add: re-read x from the input VMEM buffer instead of keeping
        # an f32 copy live across the whole fused body.
        o_ref[0] = (x_ref[0].astype(jnp.float32) + h).astype(o_ref.dtype)

    return kernel


def _banded_conv_weights(w_oihw, Wdim, C):
    """(C_out, C_in, 3, 3) -> (W*C, 3*W*C): the three ky-tap block-tridiagonal
    matrices (encoding kx taps + W zero padding), concatenated column-wise."""
    w = jnp.transpose(w_oihw, (2, 3, 1, 0))           # (ky, kx, ci, co)
    ind = np.zeros((3, Wdim, Wdim), np.float32)       # ind[kx, x_in, x_out]
    for kx in range(3):
        for xo in range(Wdim):
            xi = xo + kx - 1
            if 0 <= xi < Wdim:
                ind[kx, xi, xo] = 1.0
    big = jnp.einsum('kio,ykab->yiaob', jnp.asarray(ind), w)    # (3, W, C, W, C)
    big = big.reshape(3, Wdim * C, Wdim * C)                    # (ky, WC, WC)
    return jnp.transpose(big, (1, 0, 2)).reshape(Wdim * C, 3 * Wdim * C)


def _group_mean_matrix(Wdim, C):
    """Block-diagonal (W*C, W*C): x @ A = per-pixel channel mean, broadcast over C."""
    return jnp.asarray(np.kron(np.eye(Wdim, dtype=np.float32),
                               np.full((C, C), 1.0 / C, dtype=np.float32)))


def _plan_blocks(n, h, wc):
    """Per-generation choice of images-per-step (nb), grid length, padded N, VMEM limit.

    The fused 6-stage body keeps ~6-8 live (M, WC) f32 intermediates, so the
    activation-block cap is ~1/10 of the usable VMEM budget, not 1/4.
    """
    try:
        kind = jax.devices()[0].device_kind.lower()
    except Exception:
        kind = ""
    if "v7" in kind:
        # 64 MiB physical / 32 MiB scoped per TC; 2 TCs -> even, balanced grid.
        act_cap, vmem_limit, min_steps = int(2.5 * (1 << 20)), 40 << 20, 2
    elif "v6" in kind:
        act_cap, vmem_limit, min_steps = 6 << 20, 96 << 20, 1
    else:  # v5e and older / unknown: conservative (raise the 16 MiB scoped default)
        act_cap, vmem_limit, min_steps = 3 << 20, 64 << 20, 1

    per_image = h * wc * 4                            # f32 activation bytes / image
    nb_cap = max(1, act_cap // per_image)
    g = max(min_steps, -(-n // nb_cap))               # enough steps to respect the cap
    if min_steps == 2 and g % 2:                      # keep both v7x TCs balanced
        g += 1
    nb = -(-n // g)                                   # images per step
    n_pad = g * nb                                    # pad N instead of shrinking nb
    return nb, g, n_pad, vmem_limit


def cnet_resblock_folded(x_folded, params, *, conv_dtype=jnp.float32):
    """x_folded: (N, H, W*C) with lane index = w*C + c (NHWC folded). Returns same layout."""
    g1, b1, w1, cb1, g2, b2, w2, cb2 = params
    N, H, WC = x_folded.shape
    C = g1.shape[0]
    W = WC // C

    nb, G, n_pad, vmem_limit = _plan_blocks(N, H, WC)
    x = x_folded
    if n_pad != N:
        x = jnp.pad(x, ((0, n_pad - N), (0, 0), (0, 0)))
    M = nb * H
    x = x.reshape(G, M, WC)                           # nb images stacked along rows

    avg = _group_mean_matrix(W, C)                    # LN averaging stays f32
    w1b = _banded_conv_weights(w1, W, C).astype(conv_dtype)
    w2b = _banded_conv_weights(w2, W, C).astype(conv_dtype)
    tile = lambda v: jnp.tile(v.astype(jnp.float32), W)           # (WC,)
    vecs = jnp.stack([tile(g1), tile(b1), tile(cb1),
                      tile(g2), tile(b2), tile(cb2)])             # (6, WC)

    blk_spec = pl.BlockSpec((1, M, WC), lambda n: (n, 0, 0))
    # TODO(synk): pipeline_mode=pl.Buffered(1) on the constant-index specs below
    # would drop their second VMEM buffer; left at default to keep lowering risk low.
    avg_spec = pl.BlockSpec((WC, WC), lambda n: (0, 0))
    vec_spec = pl.BlockSpec((6, WC), lambda n: (0, 0))
    w_spec = pl.BlockSpec((WC, 3 * WC), lambda n: (0, 0))

    out = pl.pallas_call(
        _make_kernel(H, M, WC, conv_dtype),
        out_shape=jax.ShapeDtypeStruct((G, M, WC), x.dtype),
        grid_spec=pltpu.PrefetchScalarGridSpec(
            num_scalar_prefetch=0,
            grid=(G,),
            in_specs=[
                blk_spec,   # x
                avg_spec,   # group-mean matrix (f32)
                vec_spec,   # packed gamma/beta/bias vectors (6, WC)
                w_spec,     # conv1 banded taps, column-concatenated (WC, 3*WC)
                w_spec,     # conv2 banded taps
            ],
            out_specs=blk_spec,
        ),
        compiler_params=pltpu.CompilerParams(
            dimension_semantics=("parallel",),
            vmem_limit_bytes=vmem_limit,
        ),
    )(x, avg, vecs, w1b, w2b)

    out = out.reshape(n_pad, H, WC)
    return out[:N] if n_pad != N else out


def cnet_resblock(x_nchw, params, *, conv_dtype=jnp.float32):
    """NCHW adapter matching the PyTorch module signature.

    TODO(synk): in a full model keep activations in the folded (N, H, W*C)
    layout end-to-end (call cnet_resblock_folded directly) so these two
    HBM-roundtrip transposes disappear (~2/3 of end-to-end HBM traffic here).
    """
    N, C, H, W = x_nchw.shape
    xf = jnp.transpose(x_nchw, (0, 2, 3, 1)).reshape(N, H, W * C)
    yf = cnet_resblock_folded(xf, params, conv_dtype=conv_dtype)
    return jnp.transpose(yf.reshape(N, H, W, C), (0, 3, 1, 2))


def reference(x_nchw, params):
    # pure-JAX reference matching the PyTorch module semantics
    g1, b1, w1, cb1, g2, b2, w2, cb2 = params
    x = jnp.transpose(x_nchw, (0, 2, 3, 1))

    def ln(h, g, b):
        mu = jnp.mean(h, axis=-1, keepdims=True)
        var = jnp.mean(jnp.square(h - mu), axis=-1, keepdims=True)
        return (h - mu) * lax.rsqrt(var + LN_EPS) * g + b

    def conv(h, w_oihw, bias):
        w_hwio = jnp.transpose(w_oihw, (2, 3, 1, 0))
        y = lax.conv_general_dilated(
            h, w_hwio, window_strides=(1, 1), padding="SAME",
            dimension_numbers=("NHWC", "HWIO", "NHWC"))
        return y + bias

    h = jax.nn.gelu(ln(x, g1, b1), approximate=False)
    h = conv(h, w1, cb1)
    h = jax.nn.gelu(ln(h, g2, b2), approximate=False)
    h = conv(h, w2, cb2)
    return jnp.transpose(x + h, (0, 3, 1, 2))


if __name__ == "__main__":
    N, C, H, W = 2, 8, 16, 16                         # W*C = 128 -> lane-dense blocks
    key = jax.random.PRNGKey(0)
    ks = jax.random.split(key, 9)

    x = jax.random.normal(ks[0], (N, C, H, W), dtype=jnp.float32)
    g1 = 1.0 + 0.1 * jax.random.normal(ks[1], (C,), dtype=jnp.float32)
    b1 = 0.1 * jax.random.normal(ks[2], (C,), dtype=jnp.float32)
    w1 = 0.1 * jax.random.normal(ks[3], (C, C, 3, 3), dtype=jnp.float32)
    cb1 = 0.1 * jax.random.normal(ks[4], (C,), dtype=jnp.float32)
    g2 = 1.0 + 0.1 * jax.random.normal(ks[5], (C,), dtype=jnp.float32)
    b2 = 0.1 * jax.random.normal(ks[6], (C,), dtype=jnp.float32)
    w2 = 0.1 * jax.random.normal(ks[7], (C, C, 3, 3), dtype=jnp.float32)
    cb2 = 0.1 * jax.random.normal(ks[8], (C,), dtype=jnp.float32)
    params = (g1, b1, w1, cb1, g2, b2, w2, cb2)

    ref = jax.block_until_ready(reference(x, params))

    # f32 conv operands: must match the module to 1e-4.
    out = jax.block_until_ready(cnet_resblock(x, params))
    np.testing.assert_allclose(np.asarray(out), np.asarray(ref), rtol=1e-4, atol=1e-4)

    # bf16 conv operands (f32 accumulate): production path for v6e/v7x MXU throughput;
    # validated only to a loose tolerance here.
    out_bf16 = jax.block_until_ready(cnet_resblock(x, params, conv_dtype=jnp.bfloat16))
    np.testing.assert_allclose(np.asarray(out_bf16), np.asarray(ref), rtol=5e-2, atol=5e-2)

    print("KERNEL_OK")
</pallas_src>

<mosaic_0001>
module attributes {stable_mosaic.version = 11 : i64} {
  func.func @kernel(%arg0: i32, %arg1: memref<1x32x128xf32, #tpu.memory_space<vmem>>, %arg2: memref<128x128xf32, #tpu.memory_space<vmem>>, %arg3: memref<6x128xf32, #tpu.memory_space<vmem>>, %arg4: memref<128x384xf32, #tpu.memory_space<vmem>>, %arg5: memref<128x384xf32, #tpu.memory_space<vmem>>, %arg6: memref<1x32x128xf32, #tpu.memory_space<vmem>>) attributes {dimension_semantics = [#tpu.dimension_semantics<parallel>], iteration_bounds = array<i64: 1>, scalar_prefetch = 0 : i64, scratch_operands = 0 : i64, tpu.core_type = #tpu.core_type<tc>, window_params = [{transform_indices = @transform_0, window_bounds = array<i64: 1, 32, 128>}, {pipeline_mode = #tpu.pipeline_mode<synchronous>, transform_indices = @transform_1, window_bounds = array<i64: 128, 128>}, {pipeline_mode = #tpu.pipeline_mode<synchronous>, transform_indices = @transform_2, window_bounds = array<i64: 6, 128>}, {pipeline_mode = #tpu.pipeline_mode<synchronous>, transform_indices = @transform_3, window_bounds = array<i64: 128, 384>}, {pipeline_mode = #tpu.pipeline_mode<synchronous>, transform_indices = @transform_4, window_bounds = array<i64: 128, 384>}, {transform_indices = @transform_5, window_bounds = array<i64: 1, 32, 128>}]} {
    %c0 = arith.constant 0 : index
    %c0_0 = arith.constant 0 : index
    %0 = vector.load %arg2[%c0, %c0_0] : memref<128x128xf32, #tpu.memory_space<vmem>>, vector<128x128xf32>
    %1 = tpu.iota {dimensions = array<i32: 0>} : vector<32x1xi32>
    %c16_i32 = arith.constant 16 : i32
    %c0_i32 = arith.constant 0 : i32
    %2 = arith.cmpi eq, %c16_i32, %c0_i32 : i32
    %c1_i32 = arith.constant 1 : i32
    %3 = arith.select %2, %c1_i32, %c16_i32 : i32
    %4 = vector.broadcast %3 : i32 to vector<32x1xi32>
    %5 = arith.remsi %1, %4 : vector<32x1xi32>
    %c0_i32_1 = arith.constant 0 : i32
    %6 = vector.broadcast %c0_i32_1 : i32 to vector<32x1xi32>
    %7 = arith.cmpi ne, %5, %6 : vector<32x1xi32>
    %c0_i32_2 = arith.constant 0 : i32
    %8 = vector.broadcast %c0_i32_2 : i32 to vector<32x1xi32>
    %9 = arith.cmpi slt, %5, %8 : vector<32x1xi32>
    %c0_i32_3 = arith.constant 0 : i32
    %10 = arith.cmpi slt, %3, %c0_i32_3 : i32
    %11 = vector.broadcast %10 : i1 to vector<32x1xi1>
    %12 = vector.broadcast %11 : vector<32x1xi1> to vector<32x1xi1>
    %13 = arith.xori %9, %12 : vector<32x1xi1>
    %14 = arith.andi %13, %7 : vector<32x1xi1>
    %15 = vector.broadcast %3 : i32 to vector<32x1xi32>
    %16 = arith.addi %5, %15 : vector<32x1xi32>
    %17 = arith.select %14, %16, %5 : vector<32x1xi1>, vector<32x1xi32>
    %c0_i32_4 = arith.constant 0 : i32
    %18 = vector.broadcast %c0_i32_4 : i32 to vector<32x1xi32>
    %19 = arith.cmpi eq, %17, %18 : vector<32x1xi32>
    %c16_i32_5 = arith.constant 16 : i32
    %c0_i32_6 = arith.constant 0 : i32
    %20 = arith.cmpi eq, %c16_i32_5, %c0_i32_6 : i32
    %c1_i32_7 = arith.constant 1 : i32
    %21 = arith.select %20, %c1_i32_7, %c16_i32_5 : i32
    %22 = vector.broadcast %21 : i32 to vector<32x1xi32>
    %23 = arith.remsi %1, %22 : vector<32x1xi32>
    %c0_i32_8 = arith.constant 0 : i32
    %24 = vector.broadcast %c0_i32_8 : i32 to vector<32x1xi32>
    %25 = arith.cmpi ne, %23, %24 : vector<32x1xi32>
    %c0_i32_9 = arith.constant 0 : i32
    %26 = vector.broadcast %c0_i32_9 : i32 to vector<32x1xi32>
    %27 = arith.cmpi slt, %23, %26 : vector<32x1xi32>
    %c0_i32_10 = arith.constant 0 : i32
    %28 = arith.cmpi slt, %21, %c0_i32_10 : i32
    %29 = vector.broadcast %28 : i1 to vector<32x1xi1>
    %30 = vector.broadcast %29 : vector<32x1xi1> to vector<32x1xi1>
    %31 = arith.xori %27, %30 : vector<32x1xi1>
    %32 = arith.andi %31, %25 : vector<32x1xi1>
    %33 = vector.broadcast %21 : i32 to vector<32x1xi32>
    %34 = arith.addi %23, %33 : vector<32x1xi32>
    %35 = arith.select %32, %34, %23 : vector<32x1xi1>, vector<32x1xi32>
    %c15_i32 = arith.constant 15 : i32
    %36 = vector.broadcast %c15_i32 : i32 to vector<32x1xi32>
    %37 = arith.cmpi eq, %35, %36 : vector<32x1xi32>
    %c0_11 = arith.constant 0 : index
    %c0_12 = arith.constant 0 : index
    %c0_13 = arith.constant 0 : index
    %38 = vector.load %arg1[%c0_11, %c0_12, %c0_13] : memref<1x32x128xf32, #tpu.memory_space<vmem>>, vector<1x32x128xf32>
    %39 = vector.shape_cast %38 : vector<1x32x128xf32> to vector<32x128xf32>
    %c0_14 = arith.constant 0 : index
    %c0_15 = arith.constant 0 : index
    %40 = vector.load %arg3[%c0_14, %c0_15] : memref<6x128xf32, #tpu.memory_space<vmem>>, vector<1x128xf32>
    %c1 = arith.constant 1 : index
    %c0_16 = arith.constant 0 : index
    %41 = vector.load %arg3[%c1, %c0_16] : memref<6x128xf32, #tpu.memory_space<vmem>>, vector<1x128xf32>
    %42 = arith.mulf %39, %39 : vector<32x128xf32>
    %43 = tpu.concatenate %39, %42 in 0 : vector<32x128xf32>, vector<32x128xf32> -> vector<64x128xf32>
    %cst = arith.constant dense<0.000000e+00> : vector<64x128xf32>
    %44 = tpu.matmul %43, %0, %cst {dimension_numbers = #tpu.dot_dimension_numbers<[1], [0], [0], [1], [0, 0, 1, 1], [], []>} : vector<64x128xf32>, vector<128x128xf32>, vector<64x128xf32> -> vector<64x128xf32>
    %45 = vector.extract_strided_slice %44 {offsets = [0, 0], sizes = [32, 128], strides = [1, 1]} : vector<64x128xf32> to vector<32x128xf32>
    %46 = vector.extract_strided_slice %44 {offsets = [32, 0], sizes = [32, 128], strides = [1, 1]} : vector<64x128xf32> to vector<32x128xf32>
    %47 = arith.mulf %45, %45 : vector<32x128xf32>
    %48 = arith.subf %46, %47 : vector<32x128xf32>
    %49 = arith.subf %39, %45 : vector<32x128xf32>
    %cst_17 = arith.constant 9.99999974E-6 : f32
    %50 = vector.broadcast %cst_17 : f32 to vector<32x128xf32>
    %51 = arith.addf %48, %50 : vector<32x128xf32>
    %52 = math.rsqrt %51 : vector<32x128xf32>
    %53 = arith.mulf %49, %52 : vector<32x128xf32>
    %54 = vector.broadcast %40 : vector<1x128xf32> to vector<32x128xf32>
    %55 = arith.mulf %53, %54 : vector<32x128xf32>
    %56 = vector.broadcast %41 : vector<1x128xf32> to vector<32x128xf32>
    %57 = arith.addf %55, %56 : vector<32x128xf32>
    %cst_18 = arith.constant 5.000000e-01 : f32
    %58 = vector.broadcast %cst_18 : f32 to vector<32x128xf32>
    %59 = arith.mulf %58, %57 : vector<32x128xf32>
    %cst_19 = arith.constant 0.707106769 : f32
    %60 = vector.broadcast %cst_19 : f32 to vector<32x128xf32>
    %61 = arith.mulf %57, %60 : vector<32x128xf32>
    %62 = math.erf %61 : vector<32x128xf32>
    %cst_20 = arith.constant 1.000000e+00 : f32
    %63 = vector.broadcast %cst_20 : f32 to vector<32x128xf32>
    %64 = arith.addf %63, %62 : vector<32x128xf32>
    %65 = arith.mulf %59, %64 : vector<32x128xf32>
    %c2 = arith.constant 2 : index
    %c0_21 = arith.constant 0 : index
    %66 = vector.load %arg3[%c2, %c0_21] : memref<6x128xf32, #tpu.memory_space<vmem>>, vector<1x128xf32>
    %c0_22 = arith.constant 0 : index
    %c0_23 = arith.constant 0 : index
    %67 = vector.load %arg4[%c0_22, %c0_23] : memref<128x384xf32, #tpu.memory_space<vmem>>, vector<128x384xf32>
    %cst_24 = arith.constant dense<0.000000e+00> : vector<32x384xf32>
    %68 = tpu.matmul %65, %67, %cst_24 {dimension_numbers = #tpu.dot_dimension_numbers<[1], [0], [0], [1], [0, 0, 1, 1], [], []>} : vector<32x128xf32>, vector<128x384xf32>, vector<32x384xf32> -> vector<32x384xf32>
    %69 = vector.extract_strided_slice %68 {offsets = [0, 0], sizes = [32, 128], strides = [1, 1]} : vector<32x384xf32> to vector<32x128xf32>
    %70 = vector.extract_strided_slice %68 {offsets = [0, 128], sizes = [32, 128], strides = [1, 1]} : vector<32x384xf32> to vector<32x128xf32>
    %71 = vector.extract_strided_slice %68 {offsets = [0, 256], sizes = [32, 128], strides = [1, 1]} : vector<32x384xf32> to vector<32x128xf32>
    %72 = vector.broadcast %66 : vector<1x128xf32> to vector<32x128xf32>
    %73 = arith.addf %70, %72 : vector<32x128xf32>
    %c1_i32_25 = arith.constant 1 : i32
    %74 = tpu.dynamic_rotate %69 by %c1_i32_25 dim 0 : vector<32x128xf32>, i32 -> vector<32x128xf32>
    %cst_26 = arith.constant 0.000000e+00 : f32
    %75 = vector.shape_cast %19 : vector<32x1xi1> to vector<32x1xi1>
    %76 = vector.broadcast %75 : vector<32x1xi1> to vector<32x128xi1>
    %77 = vector.broadcast %cst_26 : f32 to vector<32x128xf32>
    %78 = arith.select %76, %77, %74 : vector<32x128xi1>, vector<32x128xf32>
    %79 = arith.addf %73, %78 : vector<32x128xf32>
    %c31_i32 = arith.constant 31 : i32
    %80 = tpu.dynamic_rotate %71 by %c31_i32 dim 0 : vector<32x128xf32>, i32 -> vector<32x128xf32>
    %cst_27 = arith.constant 0.000000e+00 : f32
    %81 = vector.shape_cast %37 : vector<32x1xi1> to vector<32x1xi1>
    %82 = vector.broadcast %81 : vector<32x1xi1> to vector<32x128xi1>
    %83 = vector.broadcast %cst_27 : f32 to vector<32x128xf32>
    %84 = arith.select %82, %83, %80 : vector<32x128xi1>, vector<32x128xf32>
    %85 = arith.addf %79, %84 : vector<32x128xf32>
    %c3 = arith.constant 3 : index
    %c0_28 = arith.constant 0 : index
    %86 = vector.load %arg3[%c3, %c0_28] : memref<6x128xf32, #tpu.memory_space<vmem>>, vector<1x128xf32>
    %c4 = arith.constant 4 : index
    %c0_29 = arith.constant 0 : index
    %87 = vector.load %arg3[%c4, %c0_29] : memref<6x128xf32, #tpu.memory_space<vmem>>, vector<1x128xf32>
    %88 = arith.mulf %85, %85 : vector<32x128xf32>
    %89 = tpu.concatenate %85, %88 in 0 : vector<32x128xf32>, vector<32x128xf32> -> vector<64x128xf32>
    %cst_30 = arith.constant dense<0.000000e+00> : vector<64x128xf32>
    %90 = tpu.matmul %89, %0, %cst_30 {dimension_numbers = #tpu.dot_dimension_numbers<[1], [0], [0], [1], [0, 0, 1, 1], [], []>} : vector<64x128xf32>, vector<128x128xf32>, vector<64x128xf32> -> vector<64x128xf32>
    %91 = vector.extract_strided_slice %90 {offsets = [0, 0], sizes = [32, 128], strides = [1, 1]} : vector<64x128xf32> to vector<32x128xf32>
    %92 = vector.extract_strided_slice %90 {offsets = [32, 0], sizes = [32, 128], strides = [1, 1]} : vector<64x128xf32> to vector<32x128xf32>
    %93 = arith.mulf %91, %91 : vector<32x128xf32>
    %94 = arith.subf %92, %93 : vector<32x128xf32>
    %95 = arith.subf %85, %91 : vector<32x128xf32>
    %cst_31 = arith.constant 9.99999974E-6 : f32
    %96 = vector.broadcast %cst_31 : f32 to vector<32x128xf32>
    %97 = arith.addf %94, %96 : vector<32x128xf32>
    %98 = math.rsqrt %97 : vector<32x128xf32>
    %99 = arith.mulf %95, %98 : vector<32x128xf32>
    %100 = vector.broadcast %86 : vector<1x128xf32> to vector<32x128xf32>
    %101 = arith.mulf %99, %100 : vector<32x128xf32>
    %102 = vector.broadcast %87 : vector<1x128xf32> to vector<32x128xf32>
    %103 = arith.addf %101, %102 : vector<32x128xf32>
    %cst_32 = arith.constant 5.000000e-01 : f32
    %104 = vector.broadcast %cst_32 : f32 to vector<32x128xf32>
    %105 = arith.mulf %104, %103 : vector<32x128xf32>
    %cst_33 = arith.constant 0.707106769 : f32
    %106 = vector.broadcast %cst_33 : f32 to vector<32x128xf32>
    %107 = arith.mulf %103, %106 : vector<32x128xf32>
    %108 = math.erf %107 : vector<32x128xf32>
    %cst_34 = arith.constant 1.000000e+00 : f32
    %109 = vector.broadcast %cst_34 : f32 to vector<32x128xf32>
    %110 = arith.addf %109, %108 : vector<32x128xf32>
    %111 = arith.mulf %105, %110 : vector<32x128xf32>
    %c5 = arith.constant 5 : index
    %c0_35 = arith.constant 0 : index
    %112 = vector.load %arg3[%c5, %c0_35] : memref<6x128xf32, #tpu.memory_space<vmem>>, vector<1x128xf32>
    %c0_36 = arith.constant 0 : index
    %c0_37 = arith.constant 0 : index
    %113 = vector.load %arg5[%c0_36, %c0_37] : memref<128x384xf32, #tpu.memory_space<vmem>>, vector<128x384xf32>
    %cst_38 = arith.constant dense<0.000000e+00> : vector<32x384xf32>
    %114 = tpu.matmul %111, %113, %cst_38 {dimension_numbers = #tpu.dot_dimension_numbers<[1], [0], [0], [1], [0, 0, 1, 1], [], []>} : vector<32x128xf32>, vector<128x384xf32>, vector<32x384xf32> -> vector<32x384xf32>
    %115 = vector.extract_strided_slice %114 {offsets = [0, 0], sizes = [32, 128], strides = [1, 1]} : vector<32x384xf32> to vector<32x128xf32>
    %116 = vector.extract_strided_slice %114 {offsets = [0, 128], sizes = [32, 128], strides = [1, 1]} : vector<32x384xf32> to vector<32x128xf32>
    %117 = vector.extract_strided_slice %114 {offsets = [0, 256], sizes = [32, 128], strides = [1, 1]} : vector<32x384xf32> to vector<32x128xf32>
    %118 = vector.broadcast %112 : vector<1x128xf32> to vector<32x128xf32>
    %119 = arith.addf %116, %118 : vector<32x128xf32>
    %c1_i32_39 = arith.constant 1 : i32
    %120 = tpu.dynamic_rotate %115 by %c1_i32_39 dim 0 : vector<32x128xf32>, i32 -> vector<32x128xf32>
    %cst_40 = arith.constant 0.000000e+00 : f32
    %121 = vector.shape_cast %19 : vector<32x1xi1> to vector<32x1xi1>
    %122 = vector.broadcast %121 : vector<32x1xi1> to vector<32x128xi1>
    %123 = vector.broadcast %cst_40 : f32 to vector<32x128xf32>
    %124 = arith.select %122, %123, %120 : vector<32x128xi1>, vector<32x128xf32>
    %125 = arith.addf %119, %124 : vector<32x128xf32>
    %c31_i32_41 = arith.constant 31 : i32
    %126 = tpu.dynamic_rotate %117 by %c31_i32_41 dim 0 : vector<32x128xf32>, i32 -> vector<32x128xf32>
    %cst_42 = arith.constant 0.000000e+00 : f32
    %127 = vector.shape_cast %37 : vector<32x1xi1> to vector<32x1xi1>
    %128 = vector.broadcast %127 : vector<32x1xi1> to vector<32x128xi1>
    %129 = vector.broadcast %cst_42 : f32 to vector<32x128xf32>
    %130 = arith.select %128, %129, %126 : vector<32x128xi1>, vector<32x128xf32>
    %131 = arith.addf %125, %130 : vector<32x128xf32>
    %c0_43 = arith.constant 0 : index
    %c0_44 = arith.constant 0 : index
    %c0_45 = arith.constant 0 : index
    %132 = vector.load %arg1[%c0_43, %c0_44, %c0_45] : memref<1x32x128xf32, #tpu.memory_space<vmem>>, vector<1x32x128xf32>
    %133 = vector.shape_cast %132 : vector<1x32x128xf32> to vector<32x128xf32>
    %134 = arith.addf %133, %131 : vector<32x128xf32>
    %c0_46 = arith.constant 0 : index
    %c0_47 = arith.constant 0 : index
    %c0_48 = arith.constant 0 : index
    %135 = vector.load %arg6[%c0_46, %c0_47, %c0_48] : memref<1x32x128xf32, #tpu.memory_space<vmem>>, vector<1x32x128xf32>
    %136 = vector.shape_cast %135 : vector<1x32x128xf32> to vector<32x128xf32>
    %137 = vector.shape_cast %134 : vector<32x128xf32> to vector<1x32x128xf32>
    tpu.vector_store %arg6[%c0_46, %c0_47, %c0_48], %137 {strides = array<i32>} : memref<1x32x128xf32, #tpu.memory_space<vmem>>, vector<1x32x128xf32>,
    return
  }
  func.func @transform_0(%arg0: i32) -> (i32, i32, i32) {
    %c0_i32 = arith.constant 0 : i32
    %c0_i32_0 = arith.constant 0 : i32
    %c0_i32_1 = arith.constant 0 : i32
    return %arg0, %c0_i32, %c0_i32_0 : i32, i32, i32
  }
  func.func @transform_1(%arg0: i32) -> (i32, i32) {
    %c0_i32 = arith.constant 0 : i32
    %c0_i32_0 = arith.constant 0 : i32
    %c0_i32_1 = arith.constant 0 : i32
    return %c0_i32, %c0_i32_0 : i32, i32
  }
  func.func @transform_2(%arg0: i32) -> (i32, i32) {
    %c0_i32 = arith.constant 0 : i32
    %c0_i32_0 = arith.constant 0 : i32
    %c0_i32_1 = arith.constant 0 : i32
    return %c0_i32, %c0_i32_0 : i32, i32
  }
  func.func @transform_3(%arg0: i32) -> (i32, i32) {
    %c0_i32 = arith.constant 0 : i32
    %c0_i32_0 = arith.constant 0 : i32
    %c0_i32_1 = arith.constant 0 : i32
    return %c0_i32, %c0_i32_0 : i32, i32
  }
  func.func @transform_4(%arg0: i32) -> (i32, i32) {
    %c0_i32 = arith.constant 0 : i32
    %c0_i32_0 = arith.constant 0 : i32
    %c0_i32_1 = arith.constant 0 : i32
    return %c0_i32, %c0_i32_0 : i32, i32
  }
  func.func @transform_5(%arg0: i32) -> (i32, i32, i32) {
    %c0_i32 = arith.constant 0 : i32
    %c0_i32_0 = arith.constant 0 : i32
    %c0_i32_1 = arith.constant 0 : i32
    return %arg0, %c0_i32, %c0_i32_0 : i32, i32, i32
  }
}

</mosaic_0001>

<bundles_post_ra>
// kernel: tpu_custom_call.1
= control target key start
LH: loop header
LB: loop body
LE: loop exit
PB: predicated region body
PF: predicated region fallthrough
CT: control target
= control target key end

     0   :  { %10 = vsyncpa [#allocation3], 0  ;;  %s2029_s0 = inlined_call_operand.hbm [shape: f32[1,32,128], index: 0, kind: input, shape index: {}]   ;;  %s2030_s1 = inlined_call_operand.hbm [shape: f32[128,128], index: 1, kind: input, shape index: {}]   ;;  %s2031_s2 = inlined_call_operand.hbm [shape: f32[6,128], index: 2, kind: input, shape index: {}]   ;;  %s2032_s3 = inlined_call_operand.hbm [shape: f32[128,384], index: 3, kind: input, shape index: {}]   ;;  %s2033_s4 = inlined_call_operand.hbm [shape: f32[128,384], index: 4, kind: input, shape index: {}]   ;;  %s2034_s5 = inlined_call_operand.hbm [shape: f32[1,32,128], index: 5, kind: output, shape index: {}]  }
   0x1   :  { %11 = vsyncpa [#allocation6], 0 }
   0x2   :  { %12 = vsyncpa [#allocation9], 0 }
   0x3   :  { %13 = vsyncpa [#allocation4], 0  ;;  %s1717_s18 = smov [#allocation5]   ;;  %s1718_s20 = smov [#allocation8]  }
   0x4   :  { %s31_s19 = sshll.u32 %s1717_s18, 4  ;;  %s53_s21 = sshll.u32 %s1718_s20, 4  ;;  %s32_s19 = int_to_ptr.vmem [resolvable:$true] %s31_s19  ;;  %s1758_s21 = int_to_ptr.vmem [resolvable:$true] %s53_s21 }
   0x5   :  { %s1577_s24 = scalar_lea.hbm %s2030_s1, 2048 }
   0x6   :  { %p1578_p0 = scmp.ne.s32.totalorder %s2030_s1, %s1577_s24  ;;  %p1581_p1 = scmp.lt.u32.totalorder %s1577_s24, %s2030_s1 }
   0x8   :  { %p1583_p2 = pnand %p1581_p1, %p1578_p0 }
   0xa   :  { %1586 = shalt.err (!%p1583_p2)
}
   0xb   :  { %s1587_s29 = scalar_lea.vmem %s32_s19, 2048  ;;  %p1592_p4 = scmp.lt.s32.totalorder %s32_s19, %s32_s19 }
   0xc   :  { %p1588_p3 = scmp.ne.s32.totalorder %s32_s19, %s1587_s29  ;;  %p1593_p5 = scmp.lt.s32.totalorder %s1587_s29, %s1587_s29 }
   0xe   :  { %p1594_p6 = por %p1593_p5, %p1592_p4 }
  0x10   :  { %p1595_p7 = pnand %p1594_p6, %p1588_p3 }
  0x12   :  { %1598 = shalt.err (!%p1595_p7)
}
  0x13   :  { %s1719_s30 = smov 128   ;;  %s1720_s6 = smov 8  }
  0x14   :  { %37 = dma.hbm_to_vmem [thread:$0]  %s2030_s1, 2048, %s32_s19, [#allocation6], %s1719_s30, %s1719_s30, %s1720_s6  }
  0x15   :  { %s1599_s11 = scalar_lea.hbm %s2032_s3, 6144 }
  0x16   :  { %p1600_p8 = scmp.ne.s32.totalorder %s2032_s3, %s1599_s11  ;;  %p1603_p9 = scmp.lt.u32.totalorder %s1599_s11, %s2032_s3 }
  0x18   :  { %p1605_p10 = pnand %p1603_p9, %p1600_p8 }
  0x1a   :  { %1608 = shalt.err (!%p1605_p10)
}
  0x1b   :  { %s1609_s16 = scalar_lea.vmem %s1758_s21, 6144  ;;  %p1614_p12 = scmp.lt.s32.totalorder %s1758_s21, %s1758_s21 }
  0x1c   :  { %p1610_p11 = scmp.ne.s32.totalorder %s1758_s21, %s1609_s16  ;;  %p1615_p13 = scmp.lt.s32.totalorder %s1609_s16, %s1609_s16 }
  0x1e   :  { %p1616_p0 = por %p1615_p13, %p1614_p12 }
  0x20   :  { %p1617_p1 = pnand %p1616_p0, %p1610_p11 }
  0x22   :  { %1620 = shalt.err (!%p1617_p1)
}
  0x23   :  { %s1721_s1 = smov 384   ;;  %s1722_s17 = smov 24  }
  0x24   :  { %59 = dma.hbm_to_vmem [thread:$0]  %s2032_s3, 6144, %s1758_s21, [#allocation9], %s1721_s1, %s1721_s1, %s1722_s17  }
  0x25   :  { %s1723_s20 = smov [#allocation2]   ;;  %s1724_s23 = smov [#allocation7]  }
  0x26   :  { %s19_s22 = sshll.u32 %s1723_s20, 4  ;;  %s44_s24 = sshll.u32 %s1724_s23, 4  ;;  %s20_s22 = int_to_ptr.vmem [resolvable:$true] %s19_s22  ;;  %s45_s24 = int_to_ptr.vmem [resolvable:$true] %s44_s24 }
  0x27   :  { %s1621_s27 = scalar_lea.hbm %s2029_s0, 512 }
  0x28   :  { %p1622_p2 = scmp.ne.s32.totalorder %s2029_s0, %s1621_s27  ;;  %p1625_p3 = scmp.lt.u32.totalorder %s1621_s27, %s2029_s0 }
  0x2a   :  { %p1627_p4 = pnand %p1625_p3, %p1622_p2 }
  0x2c   :  { %1630 = shalt.err (!%p1627_p4)
}
  0x2d   :  { %s1631_s3 = scalar_lea.vmem %s20_s22, 512  ;;  %p1636_p6 = scmp.lt.s32.totalorder %s20_s22, %s20_s22 }
  0x2e   :  { %p1632_p5 = scmp.ne.s32.totalorder %s20_s22, %s1631_s3  ;;  %p1637_p7 = scmp.lt.s32.totalorder %s1631_s3, %s1631_s3 }
  0x30   :  { %p1638_p8 = por %p1637_p7, %p1636_p6 }
  0x32   :  { %p1639_p9 = pnand %p1638_p8, %p1632_p5 }
  0x34   :  { %1642 = shalt.err (!%p1639_p9)
}
  0x35   :  { %25 = dma.hbm_to_vmem [thread:$0]  %s2029_s0, 512, %s20_s22, [#allocation3], %s1719_s30, %s1719_s30, %s1720_s6  }
  0x36   :  { %s1643_s12 = scalar_lea.hbm %s2031_s2, 128 }
  0x37   :  { %p1644_p10 = scmp.ne.s32.totalorder %s2031_s2, %s1643_s12  ;;  %p1647_p11 = scmp.lt.u32.totalorder %s1643_s12, %s2031_s2 }
  0x39   :  { %p1649_p12 = pnand %p1647_p11, %p1644_p10 }
  0x3b   :  { %1652 = shalt.err (!%p1649_p12)
}
  0x3c   :  { %s1653_s18 = scalar_lea.vmem %s45_s24, 128  ;;  %p1658_p0 = scmp.lt.s32.totalorder %s45_s24, %s45_s24 }
  0x3d   :  { %p1654_p13 = scmp.ne.s32.totalorder %s45_s24, %s1653_s18  ;;  %p1659_p1 = scmp.lt.s32.totalorder %s1653_s18, %s1653_s18 }
  0x3f   :  { %p1660_p2 = por %p1659_p1, %p1658_p0 }
  0x41   :  { %p1661_p3 = pnand %p1660_p2, %p1654_p13 }
  0x43   :  { %1664 = shalt.err (!%p1661_p3)
}
  0x44   :  { %47 = dma.hbm_to_vmem [thread:$0]  %s2031_s2, 128, %s45_s24, [#allocation6]  }
  0x45   :  { %s1725_s20 = smov [#allocation10]   ;;  %s1665_s26 = scalar_lea.hbm %s2033_s4, 6144 }
  0x46   :  { %s65_s22 = sshll.u32 %s1725_s20, 4  ;;  %p1666_p4 = scmp.ne.s32.totalorder %s2033_s4, %s1665_s26  ;;  %s66_s22 = int_to_ptr.vmem [resolvable:$true] %s65_s22 }
  0x47   :  { %p1669_p5 = scmp.lt.u32.totalorder %s1665_s26, %s2033_s4 }
  0x49   :  { %p1671_p6 = pnand %p1669_p5, %p1666_p4 }
  0x4b   :  { %1674 = shalt.err (!%p1671_p6)
}
  0x4c   :  { %s1675_s8 = scalar_lea.vmem %s66_s22, 6144  ;;  %p1680_p8 = scmp.lt.s32.totalorder %s66_s22, %s66_s22 }
  0x4d   :  { %p1676_p7 = scmp.ne.s32.totalorder %s66_s22, %s1675_s8  ;;  %p1681_p9 = scmp.lt.s32.totalorder %s1675_s8, %s1675_s8 }
  0x4f   :  { %p1682_p10 = por %p1681_p9, %p1680_p8 }
  0x51   :  { %p1683_p11 = pnand %p1682_p10, %p1676_p7 }
  0x53   :  { %1686 = shalt.err (!%p1683_p11)
}
  0x54   :  { %71 = dma.hbm_to_vmem [thread:$0]  %s2033_s4, 6144, %s66_s22, [#allocation9], %s1721_s1, %s1721_s1, %s1722_s17  }
  0x55   :  { %1709 = dma.done.wait [#allocation3], 512  }
  0x56   :  { %1710 = vsyncadd [#allocation3], 4294966784 }
  0x57   :  { %1711 = dma.done.wait [#allocation6], 2176  }
  0x58   :  { %1712 = vsyncadd [#allocation6], 4294965120 }
  0x59   :  { %1713 = dma.done.wait [#allocation9], 12288  }
  0x5a   :  { %1714 = vsyncadd [#allocation9], 4294955008  ;;  %v87_v0 = vld [vmem:[#allocation5] sm:$0xff]  ;;  %v88_v1 = vld [vmem:[#allocation5 + $0x8] sm:$0xff]  ;;  %s1727_s4 = smov [#allocation11]  }
  0x5b   :  { %v89_v2 = vld [vmem:[#allocation5 + $0x10] sm:$0xff]  ;;  %v1837_v3 = vpack.c.bf16 %v88_v1, %v87_v0  ;;  %v90_v4 = vld [vmem:[#allocation5 + $0x18] sm:$0xff]  ;;  %v91_v6 = vld [vmem:[#allocation5 + $0x20] sm:$0xff]  ;;  %s1067_s1 = sshll.u32 %s1727_s4, 4  ;;  %s1068_s1 = int_to_ptr.vmem [resolvable:$true] %s1067_s1 }
  0x5c   :  { %v1839_v5 = vpack.c.bf16 %v90_v4, %v89_v2  ;;  %v92_v7 = vld [vmem:[#allocation5 + $0x28] sm:$0xff]  ;;  %v1846_v9 = vld [vmem:[#allocation2] sm:$0xff]  ;;  %v93_v10 = vld [vmem:[#allocation5 + $0x30] sm:$0xff]  ;;  %v1726_v2 = vmov 0.0   ;;  %s1687_s17 = scalar_lea.vmem %s1068_s1, 512  ;;  %p1692_p13 = scmp.lt.s32.totalorder %s1068_s1, %s1068_s1 }
  0x5d   :  { %1340 = vmatprep.subr.bf16.mxu0 %v1837_v3  ;;  %v1844_v8 = vpack.c.bf16 %v92_v7, %v91_v6  ;;  %v94_v11 = vld [vmem:[#allocation5 + $0x38] sm:$0xff]  ;;  %1207 = vmatprep.mubr.f32.mxu0 %v1846_v9  ;;  %v95_v13 = vld [vmem:[#allocation5 + $0x40] sm:$0xff]  ;;  %v96_v14 = vld [vmem:[#allocation5 + $0x48] sm:$0xff]  ;;  %v170_v28 = vmul.f32 %v1846_v9, %v1846_v9  ;;  %p1688_p12 = scmp.ne.s32.totalorder %s1068_s1, %s1687_s17  ;;  %p1693_p0 = scmp.lt.s32.totalorder %s1687_s17, %s1687_s17 }
  0x5e   :  { %1342 = vmatpush3.bf16.msra.mxu0 %v1837_v3  ;;  %v1851_v12 = vpack.c.bf16 %v94_v11, %v93_v10  ;;  %v1855_v15 = vpack.c.bf16 %v96_v14, %v95_v13  ;;  %v97_v16 = vld [vmem:[#allocation5 + $0x50] sm:$0xff]  ;;  %v98_v17 = vld [vmem:[#allocation5 + $0x58] sm:$0xff]  ;;  %v99_v19 = vld [vmem:[#allocation5 + $0x60] sm:$0xff]  ;;  %452 = vmatprep.mubr.f32.mxu1 %v1726_v2 }
  0x5f   :  { %1344 = vmatprep.subr.bf16.mxu0 %v1839_v5  ;;  %v1859_v18 = vpack.c.bf16 %v98_v17, %v97_v16  ;;  %v100_v20 = vld [vmem:[#allocation5 + $0x68] sm:$0xff]  ;;  %v101_v22 = vld [vmem:[#allocation5 + $0x70] sm:$0xff]  ;;  %v102_v23 = vld [vmem:[#allocation5 + $0x78] sm:$0xff]  ;;  %p1694_p1 = por %p1693_p0, %p1692_p13 }
  0x60   :  { %v1863_v21 = vpack.c.bf16 %v100_v20, %v99_v19  ;;  %v1867_v24 = vpack.c.bf16 %v102_v23, %v101_v22  ;;  %v1872_v25 = vld [vmem:[#allocation2 + $0x8] sm:$0xff]  ;;  %v1874_v26 = vld [vmem:[#allocation2 + $0x10] sm:$0xff]  ;;  %v1878_v27 = vld [vmem:[#allocation2 + $0x18] sm:$0xff] }
  0x61   :  { %v171_v29 = vmul.f32 %v1872_v25, %v1872_v25  ;;  %v172_v30 = vmul.f32 %v1874_v26, %v1874_v26  ;;  %v173_v31 = vmul.f32 %v1878_v27, %v1878_v27  ;;  %v341_v32 = vld [vmem:[#allocation8 + $0x8] sm:$0xff]  ;;  %v344_v33 = vld [vmem:[#allocation8 + $0x20] sm:$0xff]  ;;  %v343_v36 = vld [vmem:[#allocation8 + $0x18] sm:$0xff]  ;;  %p1695_p2 = pnand %p1694_p1, %p1688_p12 }
  0x62   :  { %1346 = vmatpush3.bf16.msra.mxu0 %v1839_v5  ;;  %v1371_v34 = vpack.c.bf16 %v344_v33, %v341_v32  ;;  %v340_v35 = vld [vmem:[#allocation8] sm:$0xff]  ;;  %v342_v37 = vld [vmem:[#allocation8 + $0x10] sm:$0xff]  ;;  %v345_v39 = vld [vmem:[#allocation8 + $0x28] sm:$0xff] }
  0x63   :  { %1348 = vmatprep.subr.bf16.mxu0 %v1844_v8  ;;  %v1373_v38 = vpack.c.bf16 %v343_v36, %v340_v35  ;;  %v1403_v40 = vpack.c.bf16 %v345_v39, %v342_v37  ;;  %v347_v41 = vld [vmem:[#allocation8 + $0x38] sm:$0xff]  ;;  %v350_v42 = vld [vmem:[#allocation8 + $0x50] sm:$0xff]  ;;  %v349_v45 = vld [vmem:[#allocation8 + $0x48] sm:$0xff] }
  0x64   :  { %1372 = vmatprep.subr.bf16.mxu1 %v1371_v34  ;;  %v1375_v43 = vpack.c.bf16 %v350_v42, %v347_v41  ;;  %v346_v44 = vld [vmem:[#allocation8 + $0x30] sm:$0xff]  ;;  %v348_v46 = vld [vmem:[#allocation8 + $0x40] sm:$0xff]  ;;  %v351_v48 = vld [vmem:[#allocation8 + $0x58] sm:$0xff] }
  0x65   :  { %1374 = vmatpush1.bf16.msra.mxu1 %v1373_v38  ;;  %v1377_v47 = vpack.c.bf16 %v349_v45, %v346_v44  ;;  %v1407_v49 = vpack.c.bf16 %v351_v48, %v348_v46  ;;  %v353_v50 = vld [vmem:[#allocation8 + $0x68] sm:$0xff]  ;;  %v356_v51 = vld [vmem:[#allocation8 + $0x80] sm:$0xff]  ;;  %v355_v54 = vld [vmem:[#allocation8 + $0x78] sm:$0xff] }
  0x66   :  { %1350 = vmatpush3.bf16.msra.mxu0 %v1844_v8  ;;  %1376 = vmatprep.subr.bf16.mxu1 %v1375_v43  ;;  %v1379_v52 = vpack.c.bf16 %v356_v51, %v353_v50  ;;  %v352_v53 = vld [vmem:[#allocation8 + $0x60] sm:$0xff]  ;;  %v354_v55 = vld [vmem:[#allocation8 + $0x70] sm:$0xff]  ;;  %v357_v57 = vld [vmem:[#allocation8 + $0x88] sm:$0xff] }
  0x67   :  { %1352 = vmatprep.subr.bf16.mxu0 %v1851_v12  ;;  %v1381_v56 = vpack.c.bf16 %v355_v54, %v352_v53  ;;  %v1411_v58 = vpack.c.bf16 %v357_v57, %v354_v55  ;;  %v359_v59 = vld [vmem:[#allocation8 + $0x98] sm:$0xff]  ;;  %v362_v60 = vld [vmem:[#allocation8 + $0xb0] sm:$0xff]  ;;  %v361_v63 = vld [vmem:[#allocation8 + $0xa8] sm:$0xff] }
  0x68   :  { %v358_v61 = vld [vmem:[#allocation8 + $0x90] sm:$0xff]  ;;  %v1383_v62 = vpack.c.bf16 %v362_v60, %v359_v59  ;;  %v360_v0 = vld [vmem:[#allocation8 + $0xa0] sm:$0xff]  ;;  %v363_v1 = vld [vmem:[#allocation8 + $0xb8] sm:$0xff] }
  0x69   :  { %1378 = vmatpush1.bf16.msra.mxu1 %v1377_v47  ;;  %v1385_v4 = vpack.c.bf16 %v361_v63, %v358_v61  ;;  %v1415_v6 = vpack.c.bf16 %v363_v1, %v360_v0  ;;  %v365_v7 = vld [vmem:[#allocation8 + $0xc8] sm:$0xff]  ;;  %v368_v10 = vld [vmem:[#allocation8 + $0xe0] sm:$0xff]  ;;  %v367_v14 = vld [vmem:[#allocation8 + $0xd8] sm:$0xff] }
  0x6a   :  { %1354 = vmatpush3.bf16.msra.mxu0 %v1851_v12  ;;  %1380 = vmatprep.subr.bf16.mxu1 %v1379_v52  ;;  %v364_v11 = vld [vmem:[#allocation8 + $0xc0] sm:$0xff]  ;;  %v1387_v13 = vpack.c.bf16 %v368_v10, %v365_v7  ;;  %v366_v16 = vld [vmem:[#allocation8 + $0xd0] sm:$0xff]  ;;  %v369_v17 = vld [vmem:[#allocation8 + $0xe8] sm:$0xff] }
  0x6b   :  { %1356 = vmatprep.subr.bf16.mxu0 %v1855_v15  ;;  %v1419_v19 = vpack.c.bf16 %v369_v17, %v366_v16  ;;  %v371_v20 = vld [vmem:[#allocation8 + $0xf8] sm:$0xff]  ;;  %v374_v22 = vld [vmem:[#allocation8 + $0x110] sm:$0xff]  ;;  %v1389_v23 = vpack.c.bf16 %v367_v14, %v364_v11  ;;  %v373_v32 = vld [vmem:[#allocation8 + $0x108] sm:$0xff] }
  0x6c   :  { %v377_v33 = vld [vmem:[#allocation8 + $0x128] sm:$0xff]  ;;  %v380_v34 = vld [vmem:[#allocation8 + $0x140] sm:$0xff]  ;;  %v378_v37 = vld [vmem:[#allocation8 + $0x130] sm:$0xff] }
  0x6d   :  { %1382 = vmatpush1.bf16.msra.mxu1 %v1381_v56  ;;  %v381_v38 = vld [vmem:[#allocation8 + $0x148] sm:$0xff]  ;;  %v1395_v39 = vpack.c.bf16 %v380_v34, %v377_v33  ;;  %v379_v41 = vld [vmem:[#allocation8 + $0x138] sm:$0xff]  ;;  %v386_v43 = vld [vmem:[#allocation8 + $0x170] sm:$0xff] }
  0x6e   :  { %1358 = vmatpush3.bf16.msra.mxu0 %v1855_v15  ;;  %1384 = vmatprep.subr.bf16.mxu1 %v1383_v62  ;;  %v383_v42 = vld [vmem:[#allocation8 + $0x158] sm:$0xff]  ;;  %v1427_v44 = vpack.c.bf16 %v381_v38, %v378_v37  ;;  %v384_v46 = vld [vmem:[#allocation8 + $0x160] sm:$0xff]  ;;  %v385_v50 = vld [vmem:[#allocation8 + $0x168] sm:$0xff] }
  0x6f   :  { %1360 = vmatprep.subr.bf16.mxu0 %v1859_v18  ;;  %v387_v47 = vld [vmem:[#allocation8 + $0x178] sm:$0xff]  ;;  %v1399_v48 = vpack.c.bf16 %v386_v43, %v383_v42 }
  0x70   :  { %v1431_v51 = vpack.c.bf16 %v387_v47, %v384_v46 }
  0x71   :  { %1386 = vmatpush1.bf16.msra.mxu1 %v1385_v4 }
  0x72   :  { %1362 = vmatpush3.bf16.msra.mxu0 %v1859_v18  ;;  %1388 = vmatprep.subr.bf16.mxu1 %v1387_v13 }
  0x73   :  { %1364 = vmatprep.subr.bf16.mxu0 %v1863_v21 }
  0x75   :  { %1390 = vmatpush1.bf16.msra.mxu1 %v1389_v23 }
  0x76   :  { %1366 = vmatpush3.bf16.msra.mxu0 %v1863_v21 }
  0x77   :  { %1368 = vmatprep.subr.bf16.mxu0 %v1867_v24 }
  0x7a   :  { %1370 = vmatpush3.bf16.msra.mxu0 %v1867_v24 }
  0x7b   :  { %1404 = vmatprep.subr.bf16.mxu0 %v1403_v40 }
  0x7d   :  { %1208 = vmatmul.mubr.f32.vlgmr.msra.gmra.mrb[0].mxu0 %v1872_v25 }
  0x7e   :  { %1210 = vmatprep.mubr.f32.mxu0 %v1874_v26  ;;  %1406 = vmatpush3.bf16.msra.mxu0 %v1403_v40  ;;  %v376_v40 = vld [vmem:[#allocation8 + $0x120] sm:$0xff] }
  0x7f   :  { %1408 = vmatprep.subr.bf16.mxu0 %v1407_v49  ;;  %v1397_v45 = vpack.c.bf16 %v379_v41, %v376_v40 }
  0x81   :  { %1211 = vmatmul.mubr.f32.gmra.mrb[2].mxu0 %v1878_v27 }
  0x82   :  { %1213 = vmatprep.mubr.f32.mxu0 %v170_v28  ;;  %1410 = vmatpush3.bf16.msra.mxu0 %v1407_v49  ;;  %v372_v28 = vld [vmem:[#allocation8 + $0x100] sm:$0xff]  ;;  %v382_v49 = vld [vmem:[#allocation8 + $0x150] sm:$0xff] }
  0x83   :  { %1412 = vmatprep.subr.bf16.mxu0 %v1411_v58  ;;  %v1401_v52 = vpack.c.bf16 %v385_v50, %v382_v49 }
  0x85   :  { %1214 = vmatmul.mubr.f32.gmra.mrb[4].mxu0 %v171_v29  ;;  %v375_v29 = vld [vmem:[#allocation8 + $0x118] sm:$0xff] }
  0x86   :  { %1216 = vmatprep.mubr.f32.mxu0 %v172_v30  ;;  %1414 = vmatpush3.bf16.msra.mxu0 %v1411_v58  ;;  %v1391_v30 = vpack.c.bf16 %v374_v22, %v371_v20  ;;  %v1423_v35 = vpack.c.bf16 %v375_v29, %v372_v28  ;;  %v1081_v20 = vld [vmem:[#allocation7] ss:$0 sm:$0xff]  ;;  %v1082_v28 = vld [vmem:[#allocation7 + $0x1] ss:$0 sm:$0xff] }
  0x87   :  { %1416 = vmatprep.subr.bf16.mxu0 %v1415_v6 }
  0x88   :  { %1392 = vmatprep.subr.bf16.mxu1 %v1391_v30 }
  0x89   :  { %1217 = vmatmul.mubr.f32.gmra.mrb[6].mxu0 %v173_v31  ;;  %v370_v31 = vld [vmem:[#allocation8 + $0xf0] sm:$0xff] }
  0x8a   :  { %1418 = vmatpush3.bf16.msra.mxu0 %v1415_v6  ;;  %v1393_v36 = vpack.c.bf16 %v373_v32, %v370_v31 }
  0x8b   :  { %1420 = vmatprep.subr.bf16.mxu0 %v1419_v19 }
  0x8c   :  { %1394 = vmatpush1.bf16.msra.mxu1 %v1393_v36 }
  0x8d   :  { %1396 = vmatprep.subr.bf16.mxu1 %v1395_v39 }
  0x8e   :  { %1422 = vmatpush3.bf16.msra.mxu0 %v1419_v19 }
  0x8f   :  { %1424 = vmatprep.subr.bf16.mxu0 %v1423_v35 }
  0x90   :  { %1398 = vmatpush1.bf16.msra.mxu1 %v1397_v45 }
  0x91   :  { %1400 = vmatprep.subr.bf16.mxu1 %v1399_v48 }
  0x92   :  { %1426 = vmatpush3.bf16.msra.mxu0 %v1423_v35 }
  0x93   :  { %1428 = vmatprep.subr.bf16.mxu0 %v1427_v44 }
  0x94   :  { %1402 = vmatpush1.bf16.msra.mxu1 %v1401_v52 }
  0x95   :  { %1436 = vmatprep.subr.bf16.mxu1 %v1837_v3 }
  0x96   :  { %1430 = vmatpush3.bf16.msra.mxu0 %v1427_v44 }
  0x97   :  { %1432 = vmatprep.subr.bf16.mxu0 %v1431_v51 }
  0x9a   :  { %1434 = vmatpush3.bf16.msra.mxu0 %v1431_v51 }
 0x150   :  { %v1209_v53 = vpop.f32.mrb[0].mxu0 }
 0x151   :  { %v240_v54 = vpop.f32.mrb[1].mxu0  ;;  %v280_v57 = vmul.f32 %v1209_v53, %v1209_v53  ;;  %v288_v16 = vsub.f32 %v1872_v25, %v1209_v53 }
 0x152   :  { %v279_v58 = vmul.f32 %v240_v54, %v240_v54  ;;  %v287_v19 = vsub.f32 %v1846_v9, %v240_v54 }
 0x154   :  { %v1212_v55 = vpop.f32.mrb[2].mxu0 }
 0x155   :  { %v250_v56 = vpop.f32.mrb[3].mxu0  ;;  %v282_v63 = vmul.f32 %v1212_v55, %v1212_v55  ;;  %v290_v30 = vsub.f32 %v1878_v27, %v1212_v55 }
 0x156   :  { %v281_v1 = vmul.f32 %v250_v56, %v250_v56  ;;  %v289_v33 = vsub.f32 %v1874_v26, %v250_v56 }
 0x158   :  { %v1215_v59 = vpop.f32.mrb[4].mxu0 }
 0x159   :  { %v284_v60 = vsub.f32 %v1215_v59, %v280_v57  ;;  %v260_v61 = vpop.f32.mrb[5].mxu0 }
 0x15a   :  { %v283_v62 = vsub.f32 %v260_v61, %v279_v58 }
 0x15b   :  { %v292_v0 = vadd.f32 1e-05, %v284_v60 }
 0x15c   :  { %v291_v4 = vadd.f32 1e-05, %v283_v62  ;;  %v1218_v6 = vpop.f32.mrb[6].mxu0 }
 0x15d   :  { %1542 = vrsqrt.f32 %v292_v0  ;;  %v286_v7 = vsub.f32 %v1218_v6, %v282_v63  ;;  %v270_v10 = vpop.f32.mrb[7].mxu0  ;;  %v1083_v6 = vld [vmem:[#allocation7 + $0x2] ss:$0 sm:$0xff] }
 0x15e   :  { %1544 = vrsqrt.f32 %v291_v4  ;;  %v285_v11 = vsub.f32 %v270_v10, %v281_v1 }
 0x15f   :  { %v294_v13 = vadd.f32 1e-05, %v286_v7 }
 0x160   :  { %v293_v14 = vadd.f32 1e-05, %v285_v11 }
 0x161   :  { %1546 = vrsqrt.f32 %v294_v13 }
 0x162   :  { %1548 = vrsqrt.f32 %v293_v14 }
 0x167   :  { %v1543_v17 = vpop.eup %1542 }
 0x168   :  { %v1545_v22 = vpop.eup %1544  ;;  %v300_v23 = vmul.f32 %v1543_v17, %v288_v16 }
 0x169   :  { %v299_v29 = vmul.f32 %v1545_v22, %v287_v19 }
 0x16a   :  { %v308_v31 = vmul.f32 %v1081_v20, %v300_v23 }
 0x16b   :  { %v1547_v32 = vpop.eup %1546  ;;  %v307_v34 = vmul.f32 %v1081_v20, %v299_v29 }
 0x16c   :  { %v1549_v35 = vpop.eup %1548  ;;  %v316_v36 = vadd.f32 %v1082_v28, %v308_v31  ;;  %v302_v37 = vmul.f32 %v1547_v32, %v290_v30 }
 0x16d   :  { %v315_v38 = vadd.f32 %v1082_v28, %v307_v34  ;;  %v301_v39 = vmul.f32 %v1549_v35, %v289_v33 }
 0x16e   :  { %v324_v40 = vmul.f32 0.70710677, %v316_v36  ;;  %v310_v41 = vmul.f32 %v1081_v20, %v302_v37  ;;  %v320_v50 = vmul.f32 0.5, %v316_v36 }
 0x16f   :  { %v323_v9 = vmul.f32 0.70710677, %v315_v38  ;;  %v309_v42 = vmul.f32 %v1081_v20, %v301_v39  ;;  %v319_v48 = vmul.f32 0.5, %v315_v38 }
 0x170   :  { %1550 = verf.f32 %v324_v40  ;;  %v318_v43 = vadd.f32 %v1082_v28, %v310_v41 }
 0x171   :  { %1552 = verf.f32 %v323_v9  ;;  %v317_v44 = vadd.f32 %v1082_v28, %v309_v42 }
 0x172   :  { %v326_v45 = vmul.f32 0.70710677, %v318_v43  ;;  %v322_v58 = vmul.f32 0.5, %v318_v43 }
 0x173   :  { %v325_v27 = vmul.f32 0.70710677, %v317_v44  ;;  %v321_v56 = vmul.f32 0.5, %v317_v44 }
 0x174   :  { %1554 = verf.f32 %v326_v45 }
 0x175   :  { %1556 = verf.f32 %v325_v27 }
 0x17a   :  { %v1551_v46 = vpop.eup %1550 }
 0x17b   :  { %v1553_v26 = vpop.eup %1552  ;;  %v332_v47 = vadd.f32 1.0, %v1551_v46 }
 0x17c   :  { %v331_v49 = vadd.f32 1.0, %v1553_v26 }
 0x17d   :  { %v336_v54 = vmul.f32 %v332_v47, %v320_v50 }
 0x17e   :  { %v1555_v51 = vpop.eup %1554  ;;  %v335_v52 = vmul.f32 %v331_v49, %v319_v48 }
 0x17f   :  { %v1557_v53 = vpop.eup %1556  ;;  %v334_v55 = vadd.f32 1.0, %v1555_v51 }
 0x180   :  { %453 = vmatmul.mubr.f32.vlgmr.msra.gmra.mrb[0].mxu1 %v335_v52  ;;  %1251 = vmatprep.mubr.f32.mxu0 %v335_v52  ;;  %v333_v57 = vadd.f32 1.0, %v1557_v53 }
 0x181   :  { %1252 = vmatmul.mubr.f32.vlgmr.msra.gmra.mrb[8].mxu0 %v336_v54  ;;  %458 = vmatprep.mubr.f32.mxu1 %v1726_v2  ;;  %v338_v60 = vmul.f32 %v334_v55, %v322_v58 }
 0x182   :  { %v337_v59 = vmul.f32 %v333_v57, %v321_v56  ;;  %1438 = vmatpush3.bf16.msra.mxu1 %v1837_v3  ;;  %v103_v3 = vlaneseq }
 0x183   :  { %1440 = vmatprep.subr.bf16.mxu1 %v1839_v5 }
 0x184   :  { %459 = vmatmul.mubr.f32.gmra.mrb[2].mxu1 %v336_v54  ;;  %1254 = vmatprep.mubr.f32.mxu0 %v337_v59 }
 0x185   :  { %1255 = vmatmul.mubr.f32.gmra.mrb[10].mxu0 %v338_v60  ;;  %464 = vmatprep.mubr.f32.mxu1 %v1726_v2 }
 0x186   :  { %1442 = vmatpush3.bf16.msra.mxu1 %v1839_v5  ;;  %904 = vmatprep.mubr.f32.mxu0 %v1726_v2  ;;  %v1914_v5 = vshrl.u32 %v103_v3, 7  ;;  %v793_v3 = vld [vmem:[#allocation10 + $0x8] sm:$0xff] }
 0x187   :  { %1444 = vmatprep.subr.bf16.mxu1 %v1844_v8 }
 0x188   :  { %465 = vmatmul.mubr.f32.gmra.mrb[4].mxu1 %v337_v59  ;;  %vm599_vm0 = vcmp.lt.s32.totalorder %v1914_v5, 7  ;;  %vm574_vm1 = vcmp.lt.s32.totalorder %v1914_v5, 1  ;;  %v107_v19 = vadd.s32 24, %v1914_v5  ;;  %v112_v35 = vand.u32 15, %v1914_v5 }
 0x189   :  { %470 = vmatprep.mubr.f32.mxu1 %v1726_v2 }
 0x18a   :  { %1446 = vmatpush3.bf16.msra.mxu1 %v1844_v8  ;;  %v105_v8 = vadd.s32 8, %v1914_v5  ;;  %v133_v39 = vand.u32 15, %v107_v19  ;;  %vm1948_vm4 = vcmp.eq.s32.totalorder %v112_v35, 0  ;;  %v804_v19 = vld [vmem:[#allocation10 + $0x60] sm:$0xff]  ;;  %v810_v35 = vld [vmem:[#allocation10 + $0x90] sm:$0xff] }
 0x18b   :  { %1448 = vmatprep.subr.bf16.mxu1 %v1851_v12 }
 0x18c   :  { %471 = vmatmul.mubr.f32.gmra.mrb[6].mxu1 %v338_v60  ;;  %vm1952_vm5 = vcmp.eq.s32.totalorder %v133_v39, 15  ;;  %v815_v39 = vld [vmem:[#allocation10 + $0xb8] sm:$0xff] }
 0x18e   :  { %1450 = vmatpush3.bf16.msra.mxu1 %v1851_v12 }
 0x18f   :  { %1452 = vmatprep.subr.bf16.mxu1 %v1855_v15 }
 0x192   :  { %1454 = vmatpush3.bf16.msra.mxu1 %v1855_v15  ;;  %v106_v15 = vadd.s32 16, %v1914_v5 }
 0x193   :  { %1456 = vmatprep.subr.bf16.mxu1 %v1859_v18 }
 0x196   :  { %1458 = vmatpush3.bf16.msra.mxu1 %v1859_v18 }
 0x197   :  { %1460 = vmatprep.subr.bf16.mxu1 %v1863_v21 }
 0x19a   :  { %1462 = vmatpush3.bf16.msra.mxu1 %v1863_v21  ;;  %v119_v21 = vand.u32 15, %v105_v8  ;;  %v796_v8 = vld [vmem:[#allocation10 + $0x20] sm:$0xff] }
 0x19b   :  { %1464 = vmatprep.subr.bf16.mxu1 %v1867_v24 }
 0x19c   :  { %vm1925_vm2 = vcmp.eq.s32.totalorder %v119_v21, 15  ;;  %v799_v21 = vld [vmem:[#allocation10 + $0x38] sm:$0xff] }
 0x19e   :  { %1466 = vmatpush3.bf16.msra.mxu1 %v1867_v24  ;;  %v126_v24 = vand.u32 15, %v106_v15  ;;  %v792_v15 = vld [vmem:[#allocation10] sm:$0xff] }
 0x1a0   :  { %vm1931_vm3 = vcmp.eq.s32.totalorder %v126_v24, 0 }
 0x253   :  { %v454_v12 = vpop.f32.mrb[0].mxu1 }
 0x254   :  { %v456_v61 = vpop.f32.mrb[1].mxu1  ;;  %v1253_v62 = vpop.f32.mrb[8].mxu0  ;;  %v570_v4 = vrot.slane %v454_v12, 7  ;;  %v1467_v12 = vpack.c.bf16 %v796_v8, %v793_v3  ;;  %v832_v3 = vld [vmem:[#allocation10 + $0x140] sm:$0xff] }
 0x255   :  { %v596_v63 = vrot.slane %v1253_v62, 1  ;;  %v543_v18 = vpop.f32.mrb[9].mxu0  ;;  %v566_v47 = vadd.f32 %v1083_v6, %v456_v61  ;;  %v795_v61 = vld [vmem:[#allocation10 + $0x18] sm:$0xff]  ;;  %v794_v62 = vld [vmem:[#allocation10 + $0x10] sm:$0xff] }
 0x256   :  { %v595_v0 = vrot.slane %v543_v18, 1  ;;  %v797_v18 = vld [vmem:[#allocation10 + $0x28] sm:$0xff]  ;;  %1468 = vmatprep.subr.bf16.mxu0 %v1467_v12 }
 0x257   :  { %v460_v1 = vpop.f32.mrb[2].mxu1 }
 0x258   :  { %v571_v7 = vrot.slane %v460_v1, 7  ;;  %v462_v10 = vpop.f32.mrb[3].mxu1  ;;  %v1256_v11 = vpop.f32.mrb[10].mxu0  ;;  %v602_v13 = vsel %vm599_vm0, %v595_v0, %v596_v63  ;;  %v802_v1 = vld [vmem:[#allocation10 + $0x50] sm:$0xff] }
 0x259   :  { %v567_v14 = vadd.f32 %v1083_v6, %v462_v10  ;;  %v598_v16 = vrot.slane %v1256_v11, 1  ;;  %v553_v17 = vpop.f32.mrb[11].mxu0  ;;  %v1471_v24 = vpack.c.bf16 %v802_v1, %v799_v21  ;;  %v803_v11 = vld [vmem:[#allocation10 + $0x58] sm:$0xff]  ;;  %v838_v21 = vld [vmem:[#allocation10 + $0x170] sm:$0xff] }
 0x25a   :  { %v577_v20 = vsel %vm574_vm1, %v570_v4, %v571_v7  ;;  %v597_v23 = vrot.slane %v553_v17, 1 }
 0x25b   :  { %v592_v28 = vadd.f32 %v577_v20, %v567_v14  ;;  %v603_v29 = vsel %vm599_vm0, %v598_v16, %v595_v0  ;;  %v466_v30 = vpop.f32.mrb[4].mxu1  ;;  %v1499_v0 = vpack.c.bf16 %v797_v18, %v794_v62  ;;  %v805_v14 = vld [vmem:[#allocation10 + $0x68] sm:$0xff]  ;;  %v807_v20 = vld [vmem:[#allocation10 + $0x78] sm:$0xff] }
 0x25c   :  { %v601_v32 = vsel %vm599_vm0, %v596_v63, %v597_v23  ;;  %v572_v33 = vrot.slane %v466_v30, 7  ;;  %v468_v34 = vpop.f32.mrb[5].mxu1  ;;  %v600_v36 = vsel %vm599_vm0, %v597_v23, %v598_v16  ;;  %v615_v54 = vsel %vm1952_vm5, 0.0, %v603_v29  ;;  %v808_v16 = vld [vmem:[#allocation10 + $0x80] sm:$0xff]  ;;  %v806_v23 = vld [vmem:[#allocation10 + $0x70] sm:$0xff]  ;;  %v809_v29 = vld [vmem:[#allocation10 + $0x88] sm:$0xff] }
 0x25d   :  { %v613_v37 = vsel %vm1925_vm2, 0.0, %v601_v32  ;;  %v568_v38 = vadd.f32 %v1083_v6, %v468_v34  ;;  %v1469_v63 = vpack.c.bf16 %v795_v61, %v792_v15  ;;  %1500 = vmatprep.subr.bf16.mxu1 %v1499_v0  ;;  %v1475_v17 = vpack.c.bf16 %v808_v16, %v805_v14  ;;  %v811_v32 = vld [vmem:[#allocation10 + $0x98] sm:$0xff]  ;;  %v830_v15 = vld [vmem:[#allocation10 + $0x130] sm:$0xff]  ;;  %v833_v61 = vld [vmem:[#allocation10 + $0x148] sm:$0xff] }
 0x25e   :  { %v1942_v40 = vadd.f32 %v613_v37, %v592_v28  ;;  %v576_v41 = vsel %vm574_vm1, %v571_v7, %v572_v33  ;;  %v800_v7 = vld [vmem:[#allocation10 + $0x40] sm:$0xff]  ;;  %v1477_v28 = vpack.c.bf16 %v807_v20, %v804_v19  ;;  %v1507_v30 = vpack.c.bf16 %v809_v29, %v806_v23  ;;  %v831_v18 = vld [vmem:[#allocation10 + $0x138] sm:$0xff] }
 0x25f   :  { %v589_v9 = vsel %vm1931_vm3, 0.0, %v576_v41  ;;  %v472_v42 = vpop.f32.mrb[6].mxu1  ;;  %1470 = vmatpush1.bf16.msra.mxu0 %v1469_v63  ;;  %v812_v37 = vld [vmem:[#allocation10 + $0xa0] sm:$0xff]  ;;  %v817_v41 = vld [vmem:[#allocation10 + $0xc8] sm:$0xff]  ;;  %v1523_v1 = vpack.c.bf16 %v833_v61, %v830_v15 }
 0x260   :  { %v593_v43 = vadd.f32 %v589_v9, %v568_v38  ;;  %v573_v45 = vrot.slane %v472_v42, 7  ;;  %v474_v27 = vpop.f32.mrb[7].mxu1  ;;  %v623_v58 = vmul.f32 %v1942_v40, %v1942_v40  ;;  %1472 = vmatprep.subr.bf16.mxu0 %v1471_v24  ;;  %v820_v9 = vld [vmem:[#allocation10 + $0xe0] sm:$0xff]  ;;  %v1511_v42 = vpack.c.bf16 %v815_v39, %v812_v37 }
 0x261   :  { %v569_v46 = vadd.f32 %v1083_v6, %v474_v27  ;;  %v801_v6 = vld [vmem:[#allocation10 + $0x48] sm:$0xff]  ;;  %v819_v27 = vld [vmem:[#allocation10 + $0xd8] sm:$0xff]  ;;  %v828_v63 = vld [vmem:[#allocation10 + $0x120] sm:$0xff] }
 0x262   :  { %v578_v48 = vsel %vm574_vm1, %v573_v45, %v570_v4  ;;  %v575_v49 = vsel %vm574_vm1, %v572_v33, %v573_v45  ;;  %v1960_v50 = vadd.f32 %v600_v36, %v593_v43  ;;  %v798_v4 = vld [vmem:[#allocation10 + $0x30] sm:$0xff]  ;;  %v813_v36 = vld [vmem:[#allocation10 + $0xa8] sm:$0xff]  ;;  %v1483_v43 = vpack.c.bf16 %v820_v9, %v817_v41  ;;  %v816_v45 = vld [vmem:[#allocation10 + $0xc0] sm:$0xff] }
 0x263   :  { %v587_v51 = vsel %vm1948_vm4, 0.0, %v578_v48  ;;  %v594_v52 = vadd.f32 %v575_v49, %v569_v46  ;;  %v1473_v10 = vpack.c.bf16 %v801_v6, %v798_v4  ;;  %v814_v33 = vld [vmem:[#allocation10 + $0xb0] sm:$0xff]  ;;  %v1481_v38 = vpack.c.bf16 %v813_v36, %v810_v35  ;;  %v821_v48 = vld [vmem:[#allocation10 + $0xe8] sm:$0xff]  ;;  %v823_v49 = vld [vmem:[#allocation10 + $0xf8] sm:$0xff] }
 0x264   :  { %v591_v53 = vadd.f32 %v587_v51, %v566_v47  ;;  %v624_v59 = vmul.f32 %v1960_v50, %v1960_v50  ;;  %v1479_v34 = vpack.c.bf16 %v814_v33, %v811_v32  ;;  %v818_v46 = vld [vmem:[#allocation10 + $0xd0] sm:$0xff]  ;;  %v1485_v47 = vpack.c.bf16 %v819_v27, %v816_v45  ;;  %v836_v4 = vld [vmem:[#allocation10 + $0x160] sm:$0xff]  ;;  %v839_v6 = vld [vmem:[#allocation10 + $0x178] sm:$0xff] }
 0x265   :  { %v1966_v55 = vadd.f32 %v615_v54, %v594_v52  ;;  %1474 = vmatpush1.bf16.msra.mxu0 %v1473_v10  ;;  %v826_v51 = vld [vmem:[#allocation10 + $0x110] sm:$0xff]  ;;  %v1515_v52 = vpack.c.bf16 %v821_v48, %v818_v46  ;;  %v1493_v24 = vpack.c.bf16 %v831_v18, %v828_v63 }
 0x266   :  { %v1968_v56 = vadd.f32 %v602_v13, %v591_v53  ;;  %v1503_v13 = vpack.c.bf16 %v803_v11, %v800_v7  ;;  %1476 = vmatprep.subr.bf16.mxu0 %v1475_v17  ;;  %v1487_v53 = vpack.c.bf16 %v826_v51, %v823_v49  ;;  %v822_v54 = vld [vmem:[#allocation10 + $0xf0] sm:$0xff]  ;;  %v837_v11 = vld [vmem:[#allocation10 + $0x168] sm:$0xff] }
 0x267   :  { %v625_v60 = vmul.f32 %v1966_v55, %v1966_v55  ;;  %v834_v10 = vld [vmem:[#allocation10 + $0x150] sm:$0xff] }
 0x268   :  { %1289 = vmatprep.mubr.f32.mxu1 %v1968_v56  ;;  %v622_v57 = vmul.f32 %v1968_v56, %v1968_v56  ;;  %v1497_v14 = vpack.c.bf16 %v837_v11, %v834_v10 }
 0x269   :  { %1290 = vmatmul.mubr.f32.vlgmr.msra.gmra.mrb[8].mxu1 %v1942_v40  ;;  %1478 = vmatpush1.bf16.msra.mxu0 %v1477_v28 }
 0x26a   :  { %1292 = vmatprep.mubr.f32.mxu1 %v1960_v50  ;;  %1502 = vmatpush3.bf16.msra.mxu1 %v1499_v0  ;;  %v835_v0 = vld [vmem:[#allocation10 + $0x158] sm:$0xff] }
 0x26b   :  { %1504 = vmatprep.subr.bf16.mxu1 %v1503_v13  ;;  %1480 = vmatprep.subr.bf16.mxu0 %v1479_v34  ;;  %v1495_v7 = vpack.c.bf16 %v838_v21, %v835_v0 }
 0x26d   :  { %1293 = vmatmul.mubr.f32.gmra.mrb[10].mxu1 %v1966_v55  ;;  %1482 = vmatpush1.bf16.msra.mxu0 %v1481_v38 }
 0x26e   :  { %1295 = vmatprep.mubr.f32.mxu1 %v622_v57  ;;  %1506 = vmatpush3.bf16.msra.mxu1 %v1503_v13  ;;  %v825_v57 = vld [vmem:[#allocation10 + $0x108] sm:$0xff]  ;;  %v1527_v13 = vpack.c.bf16 %v839_v6, %v836_v4 }
 0x26f   :  { %1508 = vmatprep.subr.bf16.mxu1 %v1507_v30  ;;  %1484 = vmatprep.subr.bf16.mxu0 %v1483_v43  ;;  %v1489_v12 = vpack.c.bf16 %v825_v57, %v822_v54 }
 0x271   :  { %1296 = vmatmul.mubr.f32.gmra.mrb[12].mxu1 %v623_v58  ;;  %v824_v58 = vld [vmem:[#allocation10 + $0x100] sm:$0xff]  ;;  %1486 = vmatpush1.bf16.msra.mxu0 %v1485_v47  ;;  %v1084_v47 = vld [vmem:[#allocation7 + $0x3] ss:$0 sm:$0xff] }
 0x272   :  { %1298 = vmatprep.mubr.f32.mxu1 %v624_v59  ;;  %1510 = vmatpush3.bf16.msra.mxu1 %v1507_v30  ;;  %v827_v59 = vld [vmem:[#allocation10 + $0x118] sm:$0xff] }
 0x273   :  { %1512 = vmatprep.subr.bf16.mxu1 %v1511_v42  ;;  %v1519_v8 = vpack.c.bf16 %v827_v59, %v824_v58  ;;  %1488 = vmatprep.subr.bf16.mxu0 %v1487_v53 }
 0x275   :  { %1299 = vmatmul.mubr.f32.gmra.mrb[14].mxu1 %v625_v60  ;;  %v829_v60 = vld [vmem:[#allocation10 + $0x128] sm:$0xff]  ;;  %1490 = vmatpush1.bf16.msra.mxu0 %v1489_v12 }
 0x276   :  { %1514 = vmatpush3.bf16.msra.mxu1 %v1511_v42  ;;  %v1491_v62 = vpack.c.bf16 %v832_v3, %v829_v60 }
 0x277   :  { %1516 = vmatprep.subr.bf16.mxu1 %v1515_v52 }
 0x278   :  { %1492 = vmatprep.subr.bf16.mxu0 %v1491_v62 }
 0x279   :  { %1494 = vmatpush1.bf16.msra.mxu0 %v1493_v24 }
 0x27a   :  { %1518 = vmatpush3.bf16.msra.mxu1 %v1515_v52  ;;  %1496 = vmatprep.subr.bf16.mxu0 %v1495_v7  ;;  %v1085_v52 = vld [vmem:[#allocation7 + $0x4] ss:$0 sm:$0xff] }
 0x27b   :  { %1520 = vmatprep.subr.bf16.mxu1 %v1519_v8 }
 0x27d   :  { %1498 = vmatpush1.bf16.msra.mxu0 %v1497_v14 }
 0x27e   :  { %1522 = vmatpush3.bf16.msra.mxu1 %v1519_v8 }
 0x27f   :  { %1524 = vmatprep.subr.bf16.mxu1 %v1523_v1 }
 0x282   :  { %1526 = vmatpush3.bf16.msra.mxu1 %v1523_v1 }
 0x283   :  { %1528 = vmatprep.subr.bf16.mxu1 %v1527_v13 }
 0x286   :  { %1530 = vmatpush3.bf16.msra.mxu1 %v1527_v13 }
 0x33c   :  { %v1291_v16 = vpop.f32.mrb[8].mxu1 }
 0x33d   :  { %v692_v17 = vpop.f32.mrb[9].mxu1  ;;  %v732_v23 = vmul.f32 %v1291_v16, %v1291_v16  ;;  %v740_v45 = vsub.f32 %v1942_v40, %v1291_v16 }
 0x33e   :  { %v731_v28 = vmul.f32 %v692_v17, %v692_v17  ;;  %v739_v46 = vsub.f32 %v1968_v56, %v692_v17 }
 0x340   :  { %v1294_v19 = vpop.f32.mrb[10].mxu1 }
 0x341   :  { %v702_v20 = vpop.f32.mrb[11].mxu1  ;;  %v734_v34 = vmul.f32 %v1294_v19, %v1294_v19  ;;  %v742_v53 = vsub.f32 %v1966_v55, %v1294_v19 }
 0x342   :  { %v733_v36 = vmul.f32 %v702_v20, %v702_v20  ;;  %v741_v58 = vsub.f32 %v1960_v50, %v702_v20 }
 0x344   :  { %v1297_v29 = vpop.f32.mrb[12].mxu1 }
 0x345   :  { %v736_v30 = vsub.f32 %v1297_v29, %v732_v23  ;;  %v712_v32 = vpop.f32.mrb[13].mxu1 }
 0x346   :  { %v735_v33 = vsub.f32 %v712_v32, %v731_v28 }
 0x347   :  { %v744_v35 = vadd.f32 1e-05, %v736_v30 }
 0x348   :  { %v743_v37 = vadd.f32 1e-05, %v735_v33  ;;  %v1300_v38 = vpop.f32.mrb[14].mxu1 }
 0x349   :  { %1558 = vrsqrt.f32 %v744_v35  ;;  %v738_v39 = vsub.f32 %v1300_v38, %v734_v34  ;;  %v722_v41 = vpop.f32.mrb[15].mxu1 }
 0x34a   :  { %1560 = vrsqrt.f32 %v743_v37  ;;  %v737_v9 = vsub.f32 %v722_v41, %v733_v36  ;;  %v1086_v37 = vld [vmem:[#allocation7 + $0x5] ss:$0 sm:$0xff] }
 0x34b   :  { %v746_v42 = vadd.f32 1e-05, %v738_v39 }
 0x34c   :  { %v745_v43 = vadd.f32 1e-05, %v737_v9 }
 0x34d   :  { %1562 = vrsqrt.f32 %v746_v42 }
 0x34e   :  { %1564 = vrsqrt.f32 %v745_v43 }
 0x353   :  { %v1559_v27 = vpop.eup %1558 }
 0x354   :  { %v1561_v48 = vpop.eup %1560  ;;  %v752_v49 = vmul.f32 %v1559_v27, %v740_v45 }
 0x355   :  { %v751_v51 = vmul.f32 %v1561_v48, %v739_v46 }
 0x356   :  { %v760_v54 = vmul.f32 %v1084_v47, %v752_v49 }
 0x357   :  { %v1563_v57 = vpop.eup %1562  ;;  %v759_v59 = vmul.f32 %v1084_v47, %v751_v51 }
 0x358   :  { %v1565_v60 = vpop.eup %1564  ;;  %v768_v3 = vadd.f32 %v1085_v52, %v760_v54  ;;  %v754_v8 = vmul.f32 %v1563_v57, %v742_v53 }
 0x359   :  { %v767_v12 = vadd.f32 %v1085_v52, %v759_v59  ;;  %v753_v40 = vmul.f32 %v1565_v60, %v741_v58 }
 0x35a   :  { %v776_v15 = vmul.f32 0.70710677, %v768_v3  ;;  %v762_v61 = vmul.f32 %v1084_v47, %v754_v8  ;;  %v772_v6 = vmul.f32 0.5, %v768_v3 }
 0x35b   :  { %v775_v56 = vmul.f32 0.70710677, %v767_v12  ;;  %v761_v62 = vmul.f32 %v1084_v47, %v753_v40  ;;  %v771_v24 = vmul.f32 0.5, %v767_v12 }
 0x35c   :  { %1566 = verf.f32 %v776_v15  ;;  %v770_v63 = vadd.f32 %v1085_v52, %v762_v61 }
 0x35d   :  { %1568 = verf.f32 %v775_v56  ;;  %v769_v18 = vadd.f32 %v1085_v52, %v761_v62 }
 0x35e   :  { %v778_v0 = vmul.f32 0.70710677, %v770_v63  ;;  %v774_v19 = vmul.f32 0.5, %v770_v63 }
 0x35f   :  { %v777_v55 = vmul.f32 0.70710677, %v769_v18  ;;  %v773_v16 = vmul.f32 0.5, %v769_v18 }
 0x360   :  { %1570 = verf.f32 %v778_v0  ;;  %v1574_v0 = vld [vmem:[#allocation2 + $0x10] sm:$0xff] }
 0x361   :  { %1572 = verf.f32 %v777_v55 }
 0x366   :  { %v1567_v21 = vpop.eup %1566 }
 0x367   :  { %v1569_v50 = vpop.eup %1568  ;;  %v784_v1 = vadd.f32 1.0, %v1567_v21 }
 0x368   :  { %v783_v4 = vadd.f32 1.0, %v1569_v50 }
 0x369   :  { %v788_v13 = vmul.f32 %v784_v1, %v772_v6  ;;  %v1576_v6 = vld [vmem:[#allocation2] sm:$0xff] }
 0x36a   :  { %v1571_v7 = vpop.eup %1570  ;;  %v787_v10 = vmul.f32 %v783_v4, %v771_v24  ;;  %v1575_v24 = vld [vmem:[#allocation2 + $0x18] sm:$0xff] }
 0x36b   :  { %v1573_v11 = vpop.eup %1572  ;;  %v786_v14 = vadd.f32 1.0, %v1571_v7 }
 0x36c   :  { %905 = vmatmul.mubr.f32.vlgmr.msra.gmra.mrb[12].mxu0 %v787_v10  ;;  %1333 = vmatprep.mubr.f32.mxu1 %v787_v10  ;;  %v785_v17 = vadd.f32 1.0, %v1573_v11 }
 0x36d   :  { %1334 = vmatmul.mubr.f32.vlgmr.msra.gmra.mrb[16].mxu1 %v788_v13  ;;  %910 = vmatprep.mubr.f32.mxu0 %v1726_v2  ;;  %v790_v23 = vmul.f32 %v786_v14, %v774_v19 }
 0x36e   :  { %v789_v20 = vmul.f32 %v785_v17, %v773_v16 }
 0x370   :  { %911 = vmatmul.mubr.f32.gmra.mrb[14].mxu0 %v788_v13  ;;  %1336 = vmatprep.mubr.f32.mxu1 %v789_v20 }
 0x371   :  { %1337 = vmatmul.mubr.f32.gmra.mrb[18].mxu1 %v790_v23  ;;  %916 = vmatprep.mubr.f32.mxu0 %v1726_v2 }
 0x374   :  { %917 = vmatmul.mubr.f32.gmra.mrb[16].mxu0 %v789_v20 }
 0x375   :  { %922 = vmatprep.mubr.f32.mxu0 %v1726_v2 }
 0x378   :  { %923 = vmatmul.mubr.f32.gmra.mrb[18].mxu0 %v790_v23 }
 0x43f   :  { %v906_v28 = vpop.f32.mrb[12].mxu0 }
 0x440   :  { %v908_v29 = vpop.f32.mrb[13].mxu0  ;;  %v1335_v30 = vpop.f32.mrb[16].mxu1  ;;  %v1022_v36 = vrot.slane %v906_v28, 7 }
 0x441   :  { %v1039_v32 = vrot.slane %v1335_v30, 1  ;;  %v995_v33 = vpop.f32.mrb[17].mxu1  ;;  %v1018_v56 = vadd.f32 %v1086_v37, %v908_v29 }
 0x442   :  { %v1038_v34 = vrot.slane %v995_v33, 1 }
 0x443   :  { %v912_v35 = vpop.f32.mrb[14].mxu0 }
 0x444   :  { %v1044_v38 = vsel %vm599_vm0, %v1038_v34, %v1039_v32  ;;  %v1023_v39 = vrot.slane %v912_v35, 7  ;;  %v914_v41 = vpop.f32.mrb[15].mxu0  ;;  %v1338_v9 = vpop.f32.mrb[18].mxu1 }
 0x445   :  { %v1019_v42 = vadd.f32 %v1086_v37, %v914_v41  ;;  %v1041_v43 = vrot.slane %v1338_v9, 1  ;;  %v1005_v45 = vpop.f32.mrb[19].mxu1 }
 0x446   :  { %v1028_v2 = vsel %vm574_vm1, %v1022_v36, %v1023_v39  ;;  %v1040_v27 = vrot.slane %v1005_v45, 1 }
 0x447   :  { %v1035_v46 = vadd.f32 %v1028_v2, %v1019_v42  ;;  %v1045_v47 = vsel %vm599_vm0, %v1041_v43, %v1038_v34  ;;  %v918_v48 = vpop.f32.mrb[16].mxu0 }
 0x448   :  { %v1042_v49 = vsel %vm599_vm0, %v1040_v27, %v1041_v43  ;;  %v1043_v51 = vsel %vm599_vm0, %v1039_v32, %v1040_v27  ;;  %v1024_v52 = vrot.slane %v918_v48, 7  ;;  %v920_v53 = vpop.f32.mrb[17].mxu0  ;;  %v1049_v21 = vsel %vm1952_vm5, 0.0, %v1045_v47 }
 0x449   :  { %v1047_v54 = vsel %vm1925_vm2, 0.0, %v1043_v51  ;;  %v1020_v57 = vadd.f32 %v1086_v37, %v920_v53 }
 0x44a   :  { %v1051_v58 = vadd.f32 %v1047_v54, %v1035_v46  ;;  %v1027_v59 = vsel %vm574_vm1, %v1023_v39, %v1024_v52 }
 0x44b   :  { %v1032_v60 = vsel %vm1931_vm3, 0.0, %v1027_v59  ;;  %v924_v3 = vpop.f32.mrb[18].mxu0 }
 0x44c   :  { %v1055_v8 = vadd.f32 %v1051_v58, %v1872_v25  ;;  %v1036_v12 = vadd.f32 %v1032_v60, %v1020_v57  ;;  %v1025_v40 = vrot.slane %v924_v3, 7  ;;  %v926_v15 = vpop.f32.mrb[19].mxu0 }
 0x44d   :  { %v1021_v61 = vadd.f32 %v1086_v37, %v926_v15 }
 0x44e   :  { %1059 = vst [vmem:[#allocation11 + $0x8] sm:$0xff] %v1055_v8  ;;  %v1052_v62 = vadd.f32 %v1042_v49, %v1036_v12  ;;  %v1029_v22 = vsel %vm574_vm1, %v1025_v40, %v1022_v36  ;;  %v1026_v63 = vsel %vm574_vm1, %v1024_v52, %v1025_v40 }
 0x44f   :  { %v1030_v31 = vsel %vm1948_vm4, 0.0, %v1029_v22  ;;  %v1037_v18 = vadd.f32 %v1026_v63, %v1021_v61 }
 0x450   :  { %v1056_v55 = vadd.f32 %v1574_v0, %v1052_v62  ;;  %v1034_v25 = vadd.f32 %v1030_v31, %v1018_v56 }
 0x451   :  { %v1053_v50 = vadd.f32 %v1049_v21, %v1037_v18 }
 0x452   :  { %1060 = vst [vmem:[#allocation11 + $0x10] sm:$0xff] %v1056_v55  ;;  %v1050_v1 = vadd.f32 %v1044_v38, %v1034_v25 }
 0x453   :  { %v1057_v4 = vadd.f32 %v1575_v24, %v1053_v50 }
 0x454   :  { %v1054_v5 = vadd.f32 %v1576_v6, %v1050_v1 }
 0x455   :  { %1061 = vst [vmem:[#allocation11 + $0x18] sm:$0xff] %v1057_v4 }
 0x456   :  { %1058 = vst [vmem:[#allocation11] sm:$0xff] %v1054_v5 }
 0x457   :  { %1698 = shalt.err (!%p1695_p2)
}
 0x458   :  { %s1699_s9 = scalar_lea.hbm %s2034_s5, 512 }
 0x459   :  { %p1700_p3 = scmp.ne.s32.totalorder %s2034_s5, %s1699_s9  ;;  %p1703_p4 = scmp.lt.u32.totalorder %s1699_s9, %s2034_s5 }
 0x45b   :  { %p1705_p5 = pnand %p1703_p4, %p1700_p3 }
 0x45d   :  { %1708 = shalt.err (!%p1705_p5)
}
 0x45e   :  { %1073 = dma.vmem_to_hbm [thread:$0]  %s1068_s1, 512, %s2034_s5, [#allocation4], %s1719_s30, %s1719_s30, %s1720_s6  }
 0x45f   :  { %1715 = dma.done.wait [#allocation4], 512  }
 0x460   :  { %1716 = vsyncadd [#allocation4], 4294966784 }
 0x461   :  { %1077 = vsyncpa [#allocation3], 1 }
 0x462   :  { %1078 = vsyncpa [#allocation6], 1 }
 0x463   :  { %1079 = vsyncpa [#allocation9], 1 }
 0x464   :  { %1080 = vsyncpa [#allocation4], 1 }

</bundles_post_ra>
